<compile_context>
chip_gen: v7x
topology: tpu7x:2x2x1
jax: 0.10.0
libtpu: 0.0.40
codegen_flags: <defaults>
</compile_context>

<pallas_src>
import functools

import numpy as np
import jax
import jax.numpy as jnp
from jax.experimental import pallas as pl
from jax.experimental.pallas import tpu as pltpu


# ---------------------------------------------------------------------------
# Kernels
# ---------------------------------------------------------------------------

def _kron_kernel(x_ref, kt_ref, *rest, eps, affine):
    """Small-spatial path: x block is (cb, H*W); kt is ((1/k) * kron(Mh, Mw)).T."""
    if affine:
        wb_ref, o_ref = rest
    else:
        (o_ref,) = rest

    x = x_ref[...].astype(jnp.float32)                       # (cb, HW)
    # Pool x and x*x with two dots against the same resident RHS (no concat copy).
    mean_x = jnp.dot(x, kt_ref[...], preferred_element_type=jnp.float32)
    mean_xx = jnp.dot(x * x, kt_ref[...], preferred_element_type=jnp.float32)
    var = jnp.maximum(mean_xx - mean_x * mean_x, 0.0)        # guard f32 cancellation
    out = (x - mean_x) * jax.lax.rsqrt(var + eps)            # rsqrt -> EUP slot
    if affine:
        wb = wb_ref[...].astype(jnp.float32)                 # (cb, 2) = [weight, bias]
        out = out * wb[:, 0:1] + wb[:, 1:2]
    o_ref[...] = out.astype(o_ref.dtype)


def _sep_kernel(x_ref, mh_ref, mwt_ref, *rest, eps, affine):
    """Large-spatial path: separable pooling, one relayout in and one relayout out."""
    if affine:
        wb_ref, o_ref = rest
    else:
        (o_ref,) = rest

    x = x_ref[...].astype(jnp.float32)                       # (cb, H, W)
    cb, h, w = x.shape

    # Single up-front relayout (channel-major -> H-major); x*x is formed after it,
    # so only x itself crosses the XLU on the way in.
    xt = jnp.transpose(x, (1, 0, 2))                         # (H, cb, W)
    xt_m = xt.reshape(h * cb, w)                             # free merge when cb % 8 == 0

    # W-pool: (H*cb, W) @ (W, W); mwt already holds Mw^T / (k1*k2).
    tx = jnp.dot(xt_m, mwt_ref[...], preferred_element_type=jnp.float32)
    txx = jnp.dot(xt_m * xt_m, mwt_ref[...], preferred_element_type=jnp.float32)

    # H-pool: (H, H) @ (H, cb*W), back-to-back with the W-pool (no channel transpose
    # of the 2x-sized intermediate as before).
    mean_x = jnp.dot(mh_ref[...], tx.reshape(h, cb * w),
                     preferred_element_type=jnp.float32).reshape(h, cb, w)
    mean_xx = jnp.dot(mh_ref[...], txx.reshape(h, cb * w),
                      preferred_element_type=jnp.float32).reshape(h, cb, w)

    var = jnp.maximum(mean_xx - mean_x * mean_x, 0.0)        # guard f32 cancellation
    out = (xt - mean_x) * jax.lax.rsqrt(var + eps)           # normalize in (H, cb, W)
    if affine:
        wb = wb_ref[...].astype(jnp.float32)                 # (cb, 2) = [weight, bias]
        out = out * wb[:, 0].reshape(1, cb, 1) + wb[:, 1].reshape(1, cb, 1)
    # Single output relayout back to channel-major for the store.
    o_ref[...] = jnp.transpose(out, (1, 0, 2)).astype(o_ref.dtype)


# ---------------------------------------------------------------------------
# Wrapper
# ---------------------------------------------------------------------------

def _pool_matrix(size, k):
    """(size, size) matrix implementing stride-1 window-sum + replicate pad along one axis."""
    k = int(min(size, k))
    out_size = size - k + 1
    i = np.arange(out_size)[:, None]
    p = np.arange(size)[None, :]
    a = ((p >= i) & (p < i + k)).astype(np.float64)          # (out_size, size) window sums
    pad_before = (size - out_size) // 2                      # matches F.pad replicate offsets
    r = np.arange(size)
    sel = np.clip(r - pad_before, 0, out_size - 1)
    pmat = np.zeros((size, out_size), np.float64)            # (size, out_size) replicate pad
    pmat[r, sel] = 1.0
    return pmat @ a, k                                       # (size, size)


def _choose_block(nc, per_chan_io_elems, per_chan_f32_elems, io_itemsize,
                  const_alloc_bytes, align):
    """VMEM-aware channel-block size + scoped-VMEM limit.

    v5e/v6e have 128 MiB VMEM (also the fallback), v7x reports its 64 MiB itself.
    """
    try:
        cap = int(getattr(pltpu.get_tpu_info(), "vmem_capacity_bytes", 0)) or (128 << 20)
    except Exception:
        cap = 128 << 20
    vmem_limit = max(32 << 20, min(int(cap * 0.85), cap - (20 << 20)))

    # Per-channel working set: 2x double-buffered in + 2x double-buffered out
    # (io dtype) plus ~7 f32 temporaries (x, x^2, pooled x, pooled x^2, out, relayout slack).
    per_chan_bytes = per_chan_io_elems * 4 * io_itemsize + per_chan_f32_elems * 4
    # Resident constants (pooling matrices) come out of the same budget.
    budget = max(per_chan_bytes,
                 int((vmem_limit - min(const_alloc_bytes, vmem_limit // 2)) * 0.85))
    cb_max = max(1, budget // per_chan_bytes)

    if cb_max >= nc:
        cb_max = nc
    elif cb_max >= align:
        cb_max = (cb_max // align) * align                   # sublane-aligned blocks

    grid = pl.cdiv(nc, cb_max)
    # Best-effort even step count so both v7x TensorCores stay busy; on single-core
    # v5e/v6e the extra step costs < 1 us.
    if grid % 2 == 1 and nc >= 2 * align:
        grid += 1
    cb = pl.cdiv(nc, grid)
    if cb < nc:
        cb = min(cb_max, -(-cb // align) * align)
    cb = max(1, min(cb, nc))
    return int(cb), int(vmem_limit)


def local_instance_norm_2d(x, kernel_size, eps=1e-5, affine=False,
                           weight=None, bias=None, block_channels=None):
    """Forward pass of LocalInstanceNorm2d (TLC, fast_imp=False local-avg-pool path)."""
    n, c, h, w = x.shape
    mh, k1 = _pool_matrix(h, kernel_size[0])
    mw, k2 = _pool_matrix(w, kernel_size[1])
    inv_k = 1.0 / float(k1 * k2)
    itemsize = jnp.dtype(x.dtype).itemsize
    nc = n * c
    # Sublane alignment of the channel axis: 8 for 32-bit, 16 for 16-bit, 32 for 8-bit I/O.
    align = max(8, 32 // max(1, itemsize))

    # Small spatial -> full Kronecker operator (lane-dense single matmul).  Beyond
    # H*W=256 the separable path is far cheaper (O(HW*(H+W)) vs O((HW)^2) MACs).
    use_kron = (h * w) <= 256
    lane = lambda v: -(-v // 128) * 128

    has_buffered = hasattr(pl, "Buffered")
    const_pipe = {"pipeline_mode": pl.Buffered(1)} if has_buffered else {}

    if use_kron:
        hw = h * w
        per_io = lane(hw)
        per_f32 = 7 * lane(hw)
        const_bytes = lane(hw) * hw * 4
    else:
        per_io = h * lane(w)
        per_f32 = 7 * h * lane(w)
        const_bytes = (h * lane(h) + w * lane(w)) * 4
    const_alloc = const_bytes * (1 if has_buffered else 2)

    cb, vmem_limit = _choose_block(nc, per_io, per_f32, itemsize, const_alloc, align)
    if block_channels is not None:
        cb = max(1, min(nc, int(block_channels)))
    grid = pl.cdiv(nc, cb)          # no padding copy: ragged last block is masked

    xr = x.reshape(nc, h, w)        # free contiguous merge, no HBM traffic

    if affine:
        weight = jnp.ones((c,), jnp.float32) if weight is None else jnp.asarray(weight, jnp.float32)
        bias = jnp.zeros((c,), jnp.float32) if bias is None else jnp.asarray(bias, jnp.float32)
        wb = jnp.stack([jnp.tile(weight, n), jnp.tile(bias, n)], axis=-1)   # (nc, 2)

    if use_kron:
        kt = (np.kron(mh, mw) * inv_k).T.astype(np.float32)          # (HW, HW)
        args = [xr.reshape(nc, hw), jnp.asarray(kt)]
        in_specs = [pl.BlockSpec((cb, hw), lambda i: (i, 0)),
                    pl.BlockSpec((hw, hw), lambda i: (0, 0), **const_pipe)]
        out_specs = pl.BlockSpec((cb, hw), lambda i: (i, 0))
        out_shape = jax.ShapeDtypeStruct((nc, hw), x.dtype)
        kernel = functools.partial(_kron_kernel, eps=float(eps), affine=affine)
        flops = 4 * nc * hw * hw + 10 * nc * hw
    else:
        # TODO(synk): for W < 128 the separable-path stores are lane-masked; the
        # lane-packing trick (g = 128//W, block-diagonal kron(I_g, Mw^T)) is not implemented.
        mwt = (mw.T * inv_k).astype(np.float32)
        args = [xr, jnp.asarray(mh.astype(np.float32)), jnp.asarray(mwt)]
        in_specs = [pl.BlockSpec((cb, h, w), lambda i: (i, 0, 0)),
                    pl.BlockSpec((h, h), lambda i: (0, 0), **const_pipe),
                    pl.BlockSpec((w, w), lambda i: (0, 0), **const_pipe)]
        out_specs = pl.BlockSpec((cb, h, w), lambda i: (i, 0, 0))
        out_shape = jax.ShapeDtypeStruct((nc, h, w), x.dtype)
        kernel = functools.partial(_sep_kernel, eps=float(eps), affine=affine)
        flops = 4 * nc * h * w * (h + w) + 10 * nc * h * w

    if affine:
        args.append(wb)
        in_specs.append(pl.BlockSpec((cb, 2), lambda i: (i, 0)))

    out = pl.pallas_call(
        kernel,
        out_shape=out_shape,
        grid=(grid,),
        in_specs=in_specs,
        out_specs=out_specs,
        compiler_params=pltpu.CompilerParams(
            dimension_semantics=("parallel",),
            vmem_limit_bytes=vmem_limit),
        cost_estimate=pl.CostEstimate(
            flops=int(flops),
            transcendentals=int(nc * h * w),
            bytes_accessed=int(2 * nc * h * w * itemsize + const_bytes)),
    )(*args)

    return out.reshape(n, c, h, w)


# ----- pure-JAX reference mirroring the PyTorch cumsum/pad implementation -----
def _ref_avgpool(x, kernel_size):
    n, c, h, w = x.shape
    k1 = min(h, kernel_size[0])
    k2 = min(w, kernel_size[1])
    s = jnp.cumsum(jnp.cumsum(x, axis=-1), axis=-2)
    s = jnp.pad(s, ((0, 0), (0, 0), (1, 0), (1, 0)))
    s1 = s[:, :, :-k1, :-k2]
    s2 = s[:, :, :-k1, k2:]
    s3 = s[:, :, k1:, :-k2]
    s4 = s[:, :, k1:, k2:]
    out = (s4 + s1 - s2 - s3) / (k1 * k2)
    _h, _w = out.shape[2:]
    pad = ((w - _w) // 2, (w - _w + 1) // 2, (h - _h) // 2, (h - _h + 1) // 2)
    return jnp.pad(out, ((0, 0), (0, 0), (pad[2], pad[3]), (pad[0], pad[1])), mode='edge')


def _ref_local_instance_norm(x, kernel_size, eps=1e-5):
    mean_x = _ref_avgpool(x, kernel_size)
    mean_xx = _ref_avgpool(x * x, kernel_size)
    var_x = mean_xx - mean_x * mean_x
    return (x - mean_x) / jnp.sqrt(var_x + eps)


if __name__ == "__main__":
    key = jax.random.PRNGKey(0)
    kx, kw, kb = jax.random.split(key, 3)
    x = jax.random.normal(kx, (2, 4, 16, 16), dtype=jnp.float32)

    # TODO(synk): in TLC, AvgPool2d is built with kernel_size=None and configured
    # externally via base_size/train_size; here we pass the effective kernel_size
    # directly (e.g. base_size * H / train_H). fast_imp=True branch not implemented.
    kernel_size = (8, 8)

    out = jax.block_until_ready(local_instance_norm_2d(x, kernel_size, eps=1e-5, affine=False))
    ref = _ref_local_instance_norm(x, kernel_size, eps=1e-5)
    np.testing.assert_allclose(np.asarray(out), np.asarray(ref), atol=1e-3, rtol=1e-3)

    # affine=True path (weight/bias packed into one (nc, 2) operand, fused epilogue).
    w_aff = jax.random.normal(kw, (4,), jnp.float32)
    b_aff = jax.random.normal(kb, (4,), jnp.float32)
    out_aff = jax.block_until_ready(
        local_instance_norm_2d(x, kernel_size, eps=1e-5, affine=True,
                               weight=w_aff, bias=b_aff))
    ref_aff = ref * w_aff[None, :, None, None] + b_aff[None, :, None, None]
    np.testing.assert_allclose(np.asarray(out_aff), np.asarray(ref_aff), atol=1e-3, rtol=1e-3)

    # Separable (large-spatial) path.
    x2 = jax.random.normal(kx, (1, 3, 32, 128), dtype=jnp.float32)
    ks2 = (16, 48)
    out2 = jax.block_until_ready(local_instance_norm_2d(x2, ks2, eps=1e-5))
    ref2 = _ref_local_instance_norm(x2, ks2, eps=1e-5)
    np.testing.assert_allclose(np.asarray(out2), np.asarray(ref2), atol=1e-3, rtol=1e-3)

    # Multi-step grid with a ragged (masked) last channel block -- no padding copy.
    x3 = jax.random.normal(kb, (2, 5, 16, 16), dtype=jnp.float32)
    out3 = jax.block_until_ready(
        local_instance_norm_2d(x3, kernel_size, eps=1e-5, block_channels=8))
    ref3 = _ref_local_instance_norm(x3, kernel_size, eps=1e-5)
    np.testing.assert_allclose(np.asarray(out3), np.asarray(ref3), atol=1e-3, rtol=1e-3)

    print("KERNEL_OK")
</pallas_src>

<mosaic_0001>
module attributes {stable_mosaic.version = 11 : i64} {
  func.func @_kron_kernel(%arg0: i32, %arg1: memref<8x256xf32, #tpu.memory_space<vmem>>, %arg2: memref<256x256xf32, #tpu.memory_space<vmem>>, %arg3: memref<8x256xf32, #tpu.memory_space<vmem>>) attributes {dimension_semantics = [#tpu.dimension_semantics<parallel>], iteration_bounds = array<i64: 1>, scalar_prefetch = 0 : i64, scratch_operands = 0 : i64, tpu.core_type = #tpu.core_type<tc>, window_params = [{transform_indices = @transform_0, window_bounds = array<i64: 8, 256>}, {pipeline_mode = #tpu.pipeline_mode<synchronous>, transform_indices = @transform_1, window_bounds = array<i64: 256, 256>}, {transform_indices = @transform_2, window_bounds = array<i64: 8, 256>}]} {
    %c0 = arith.constant 0 : index
    %c0_0 = arith.constant 0 : index
    %0 = vector.load %arg1[%c0, %c0_0] : memref<8x256xf32, #tpu.memory_space<vmem>>, vector<8x256xf32>
    %c0_1 = arith.constant 0 : index
    %c0_2 = arith.constant 0 : index
    %1 = vector.load %arg2[%c0_1, %c0_2] : memref<256x256xf32, #tpu.memory_space<vmem>>, vector<256x256xf32>
    %cst = arith.constant dense<0.000000e+00> : vector<8x256xf32>
    %2 = tpu.matmul %0, %1, %cst {dimension_numbers = #tpu.dot_dimension_numbers<[1], [0], [0], [1], [0, 0, 1, 1], [], []>} : vector<8x256xf32>, vector<256x256xf32>, vector<8x256xf32> -> vector<8x256xf32>
    %3 = arith.mulf %0, %0 : vector<8x256xf32>
    %c0_3 = arith.constant 0 : index
    %c0_4 = arith.constant 0 : index
    %4 = vector.load %arg2[%c0_3, %c0_4] : memref<256x256xf32, #tpu.memory_space<vmem>>, vector<256x256xf32>
    %cst_5 = arith.constant dense<0.000000e+00> : vector<8x256xf32>
    %5 = tpu.matmul %3, %4, %cst_5 {dimension_numbers = #tpu.dot_dimension_numbers<[1], [0], [0], [1], [0, 0, 1, 1], [], []>} : vector<8x256xf32>, vector<256x256xf32>, vector<8x256xf32> -> vector<8x256xf32>
    %6 = arith.mulf %2, %2 : vector<8x256xf32>
    %7 = arith.subf %5, %6 : vector<8x256xf32>
    %cst_6 = arith.constant 0.000000e+00 : f32
    %8 = vector.broadcast %cst_6 : f32 to vector<8x256xf32>
    %9 = arith.maximumf %7, %8 : vector<8x256xf32>
    %10 = arith.subf %0, %2 : vector<8x256xf32>
    %cst_7 = arith.constant 9.99999974E-6 : f32
    %11 = vector.broadcast %cst_7 : f32 to vector<8x256xf32>
    %12 = arith.addf %9, %11 : vector<8x256xf32>
    %13 = math.rsqrt %12 : vector<8x256xf32>
    %14 = arith.mulf %10, %13 : vector<8x256xf32>
    %c0_8 = arith.constant 0 : index
    %c0_9 = arith.constant 0 : index
    %15 = vector.load %arg3[%c0_8, %c0_9] : memref<8x256xf32, #tpu.memory_space<vmem>>, vector<8x256xf32>
    tpu.vector_store %arg3[%c0_8, %c0_9], %14 {strides = array<i32>} : memref<8x256xf32, #tpu.memory_space<vmem>>, vector<8x256xf32>,
    return
  }
  func.func @transform_0(%arg0: i32) -> (i32, i32) {
    %c0_i32 = arith.constant 0 : i32
    %c0_i32_0 = arith.constant 0 : i32
    return %arg0, %c0_i32 : i32, i32
  }
  func.func @transform_1(%arg0: i32) -> (i32, i32) {
    %c0_i32 = arith.constant 0 : i32
    %c0_i32_0 = arith.constant 0 : i32
    %c0_i32_1 = arith.constant 0 : i32
    return %c0_i32, %c0_i32_0 : i32, i32
  }
  func.func @transform_2(%arg0: i32) -> (i32, i32) {
    %c0_i32 = arith.constant 0 : i32
    %c0_i32_0 = arith.constant 0 : i32
    return %arg0, %c0_i32 : i32, i32
  }
}

</mosaic_0001>

<bundles_post_ra>
// kernel: tpu_custom_call.1
= control target key start
LH: loop header
LB: loop body
LE: loop exit
PB: predicated region body
PF: predicated region fallthrough
CT: control target
= control target key end

     0   :  { %7 = vsyncpa [#allocation3], 0  ;;  %s558_s0 = inlined_call_operand.hbm [shape: f32[8,256], index: 0, kind: input, shape index: {}]   ;;  %s559_s1 = inlined_call_operand.hbm [shape: f32[256,256], index: 1, kind: input, shape index: {}]   ;;  %s560_s2 = inlined_call_operand.hbm [shape: f32[8,256], index: 2, kind: output, shape index: {}]  }
   0x1   :  { %8 = vsyncpa [#allocation6], 0 }
   0x2   :  { %9 = vsyncpa [#allocation4], 0  ;;  %s489_s9 = smov [#allocation2]   ;;  %s490_s11 = smov [#allocation5]  }
   0x3   :  { %s16_s10 = sshll.u32 %s489_s9, 4  ;;  %s25_s12 = sshll.u32 %s490_s11, 4  ;;  %s17_s10 = int_to_ptr.vmem [resolvable:$true] %s16_s10  ;;  %s509_s12 = int_to_ptr.vmem [resolvable:$true] %s25_s12 }
   0x4   :  { %s417_s15 = scalar_lea.hbm %s558_s0, 256 }
   0x5   :  { %p418_p0 = scmp.ne.s32.totalorder %s558_s0, %s417_s15  ;;  %p421_p1 = scmp.lt.u32.totalorder %s417_s15, %s558_s0 }
   0x7   :  { %p423_p2 = pnand %p421_p1, %p418_p0 }
   0x9   :  { %426 = shalt.err (!%p423_p2)
}
   0xa   :  { %s427_s20 = scalar_lea.vmem %s17_s10, 256  ;;  %p432_p4 = scmp.lt.s32.totalorder %s17_s10, %s17_s10 }
   0xb   :  { %p428_p3 = scmp.ne.s32.totalorder %s17_s10, %s427_s20  ;;  %p433_p5 = scmp.lt.s32.totalorder %s427_s20, %s427_s20 }
   0xd   :  { %p434_p6 = por %p433_p5, %p432_p4 }
   0xf   :  { %p435_p7 = pnand %p434_p6, %p428_p3 }
  0x11   :  { %438 = shalt.err (!%p435_p7)
}
  0x12   :  { %19 = dma.hbm_to_vmem [thread:$0]  %s558_s0, 256, %s17_s10, [#allocation3]  }
  0x13   :  { %s439_s25 = scalar_lea.hbm %s559_s1, 8192 }
  0x14   :  { %p440_p8 = scmp.ne.s32.totalorder %s559_s1, %s439_s25  ;;  %p443_p9 = scmp.lt.u32.totalorder %s439_s25, %s559_s1 }
  0x16   :  { %p445_p10 = pnand %p443_p9, %p440_p8 }
  0x18   :  { %448 = shalt.err (!%p445_p10)
}
  0x19   :  { %s449_s30 = scalar_lea.vmem %s509_s12, 8192  ;;  %p454_p12 = scmp.lt.s32.totalorder %s509_s12, %s509_s12 }
  0x1a   :  { %p450_p11 = scmp.ne.s32.totalorder %s509_s12, %s449_s30  ;;  %p455_p13 = scmp.lt.s32.totalorder %s449_s30, %s449_s30 }
  0x1c   :  { %p456_p0 = por %p455_p13, %p454_p12 }
  0x1e   :  { %p457_p1 = pnand %p456_p0, %p450_p11 }
  0x20   :  { %460 = shalt.err (!%p457_p1)
}
  0x21   :  { %s491_s0 = smov 256   ;;  %s492_s3 = smov 16  }
  0x22   :  { %31 = dma.hbm_to_vmem [thread:$0]  %s559_s1, 8192, %s509_s12, [#allocation6], %s491_s0, %s491_s0, %s492_s3  }
  0x23   :  { %483 = dma.done.wait [#allocation3], 256  }
  0x24   :  { %484 = vsyncadd [#allocation3], 4294967040 }
  0x25   :  { %485 = dma.done.wait [#allocation6], 8192  }
  0x26   :  { %486 = vsyncadd [#allocation6], 4294959104  ;;  %v41_v0 = vld [vmem:[#allocation5 + $0x8] sm:$0xff]  ;;  %v43_v1 = vld [vmem:[#allocation5 + $0x18] sm:$0xff]  ;;  %s493_s1 = smov [#allocation7]  }
  0x27   :  { %v40_v2 = vld [vmem:[#allocation5] sm:$0xff]  ;;  %v280_v3 = vpack.c.bf16 %v43_v1, %v41_v0  ;;  %v42_v4 = vld [vmem:[#allocation5 + $0x10] sm:$0xff]  ;;  %v45_v5 = vld [vmem:[#allocation5 + $0x28] sm:$0xff]  ;;  %s270_s6 = sshll.u32 %s493_s1, 4  ;;  %s271_s6 = int_to_ptr.vmem [resolvable:$true] %s270_s6 }
  0x28   :  { %v47_v6 = vld [vmem:[#allocation5 + $0x38] sm:$0xff]  ;;  %v282_v7 = vpack.c.bf16 %v42_v4, %v40_v2  ;;  %v44_v9 = vld [vmem:[#allocation5 + $0x20] sm:$0xff]  ;;  %v46_v10 = vld [vmem:[#allocation5 + $0x30] sm:$0xff]  ;;  %s461_s7 = scalar_lea.vmem %s271_s6, 256  ;;  %p466_p3 = scmp.lt.s32.totalorder %s271_s6, %s271_s6 }
  0x29   :  { %v284_v8 = vpack.c.bf16 %v47_v6, %v45_v5  ;;  %v49_v11 = vld [vmem:[#allocation5 + $0x48] sm:$0xff]  ;;  %281 = vmatprep.subr.bf16.mxu0 %v280_v3  ;;  %345 = vmatprep.subr.bf16.mxu1 %v280_v3  ;;  %v51_v12 = vld [vmem:[#allocation5 + $0x58] sm:$0xff]  ;;  %v286_v13 = vpack.c.bf16 %v46_v10, %v44_v9  ;;  %v48_v15 = vld [vmem:[#allocation5 + $0x40] sm:$0xff]  ;;  %p462_p2 = scmp.ne.s32.totalorder %s271_s6, %s461_s7  ;;  %p467_p4 = scmp.lt.s32.totalorder %s461_s7, %s461_s7 }
  0x2a   :  { %283 = vmatpush1.bf16.msra.mxu0 %v282_v7  ;;  %347 = vmatpush1.bf16.msra.mxu1 %v282_v7  ;;  %v288_v14 = vpack.c.bf16 %v51_v12, %v49_v11  ;;  %v50_v16 = vld [vmem:[#allocation5 + $0x50] sm:$0xff]  ;;  %v53_v17 = vld [vmem:[#allocation5 + $0x68] sm:$0xff]  ;;  %v55_v18 = vld [vmem:[#allocation5 + $0x78] sm:$0xff] }
  0x2b   :  { %285 = vmatprep.subr.bf16.mxu0 %v284_v8  ;;  %349 = vmatprep.subr.bf16.mxu1 %v284_v8  ;;  %v290_v19 = vpack.c.bf16 %v50_v16, %v48_v15  ;;  %v292_v20 = vpack.c.bf16 %v55_v18, %v53_v17  ;;  %v52_v21 = vld [vmem:[#allocation5 + $0x60] sm:$0xff]  ;;  %v54_v22 = vld [vmem:[#allocation5 + $0x70] sm:$0xff]  ;;  %v57_v23 = vld [vmem:[#allocation5 + $0x88] sm:$0xff]  ;;  %p468_p5 = por %p467_p4, %p466_p3 }
  0x2c   :  { %v59_v24 = vld [vmem:[#allocation5 + $0x98] sm:$0xff]  ;;  %v294_v25 = vpack.c.bf16 %v54_v22, %v52_v21  ;;  %v56_v27 = vld [vmem:[#allocation5 + $0x80] sm:$0xff]  ;;  %v58_v28 = vld [vmem:[#allocation5 + $0x90] sm:$0xff] }
  0x2d   :  { %v296_v26 = vpack.c.bf16 %v59_v24, %v57_v23  ;;  %v61_v29 = vld [vmem:[#allocation5 + $0xa8] sm:$0xff]  ;;  %v63_v30 = vld [vmem:[#allocation5 + $0xb8] sm:$0xff]  ;;  %v298_v31 = vpack.c.bf16 %v58_v28, %v56_v27  ;;  %v60_v33 = vld [vmem:[#allocation5 + $0xa0] sm:$0xff]  ;;  %p469_p6 = pnand %p468_p5, %p462_p2 }
  0x2e   :  { %287 = vmatpush1.bf16.msra.mxu0 %v286_v13  ;;  %351 = vmatpush1.bf16.msra.mxu1 %v286_v13  ;;  %v300_v32 = vpack.c.bf16 %v63_v30, %v61_v29  ;;  %v62_v34 = vld [vmem:[#allocation5 + $0xb0] sm:$0xff]  ;;  %v65_v35 = vld [vmem:[#allocation5 + $0xc8] sm:$0xff]  ;;  %v67_v36 = vld [vmem:[#allocation5 + $0xd8] sm:$0xff] }
  0x2f   :  { %289 = vmatprep.subr.bf16.mxu0 %v288_v14  ;;  %353 = vmatprep.subr.bf16.mxu1 %v288_v14  ;;  %v302_v37 = vpack.c.bf16 %v62_v34, %v60_v33  ;;  %v304_v38 = vpack.c.bf16 %v67_v36, %v65_v35  ;;  %v64_v39 = vld [vmem:[#allocation5 + $0xc0] sm:$0xff]  ;;  %v66_v40 = vld [vmem:[#allocation5 + $0xd0] sm:$0xff]  ;;  %v540_v41 = vld [vmem:[#allocation2 + $0x8] sm:$0xff] }
  0x30   :  { %v69_v42 = vld [vmem:[#allocation5 + $0xe8] sm:$0xff]  ;;  %v71_v43 = vld [vmem:[#allocation5 + $0xf8] sm:$0xff]  ;;  %168 = vmatprep.mubr.f32.mxu0 %v540_v41  ;;  %v176_v44 = vmul.f32 %v540_v41, %v540_v41  ;;  %v306_v45 = vpack.c.bf16 %v66_v40, %v64_v39  ;;  %v68_v47 = vld [vmem:[#allocation5 + $0xe0] sm:$0xff] }
  0x31   :  { %v308_v46 = vpack.c.bf16 %v71_v43, %v69_v42  ;;  %v70_v48 = vld [vmem:[#allocation5 + $0xf0] sm:$0xff]  ;;  %v73_v49 = vld [vmem:[#allocation5 + $0x108] sm:$0xff]  ;;  %v75_v50 = vld [vmem:[#allocation5 + $0x118] sm:$0xff] }
  0x32   :  { %291 = vmatpush1.bf16.msra.mxu0 %v290_v19  ;;  %355 = vmatpush1.bf16.msra.mxu1 %v290_v19  ;;  %v310_v51 = vpack.c.bf16 %v70_v48, %v68_v47  ;;  %v312_v52 = vpack.c.bf16 %v75_v50, %v73_v49  ;;  %v72_v53 = vld [vmem:[#allocation5 + $0x100] sm:$0xff]  ;;  %v74_v54 = vld [vmem:[#allocation5 + $0x110] sm:$0xff]  ;;  %v77_v55 = vld [vmem:[#allocation5 + $0x128] sm:$0xff] }
  0x33   :  { %293 = vmatprep.subr.bf16.mxu0 %v292_v20  ;;  %357 = vmatprep.subr.bf16.mxu1 %v292_v20  ;;  %v79_v56 = vld [vmem:[#allocation5 + $0x138] sm:$0xff]  ;;  %v314_v57 = vpack.c.bf16 %v74_v54, %v72_v53  ;;  %v76_v59 = vld [vmem:[#allocation5 + $0x120] sm:$0xff]  ;;  %v78_v60 = vld [vmem:[#allocation5 + $0x130] sm:$0xff] }
  0x34   :  { %241 = vmatprep.mubr.f32.mxu1 %v176_v44  ;;  %v316_v58 = vpack.c.bf16 %v79_v56, %v77_v55  ;;  %v81_v61 = vld [vmem:[#allocation5 + $0x148] sm:$0xff]  ;;  %v83_v62 = vld [vmem:[#allocation5 + $0x158] sm:$0xff]  ;;  %v318_v63 = vpack.c.bf16 %v78_v60, %v76_v59  ;;  %v80_v1 = vld [vmem:[#allocation5 + $0x140] sm:$0xff] }
  0x35   :  { %v320_v0 = vpack.c.bf16 %v83_v62, %v81_v61  ;;  %v82_v2 = vld [vmem:[#allocation5 + $0x150] sm:$0xff]  ;;  %v85_v3 = vld [vmem:[#allocation5 + $0x168] sm:$0xff]  ;;  %v87_v4 = vld [vmem:[#allocation5 + $0x178] sm:$0xff] }
  0x36   :  { %295 = vmatpush1.bf16.msra.mxu0 %v294_v25  ;;  %359 = vmatpush1.bf16.msra.mxu1 %v294_v25  ;;  %v322_v5 = vpack.c.bf16 %v82_v2, %v80_v1  ;;  %v324_v6 = vpack.c.bf16 %v87_v4, %v85_v3  ;;  %v84_v7 = vld [vmem:[#allocation5 + $0x160] sm:$0xff]  ;;  %v86_v8 = vld [vmem:[#allocation5 + $0x170] sm:$0xff]  ;;  %v89_v9 = vld [vmem:[#allocation5 + $0x188] sm:$0xff] }
  0x37   :  { %297 = vmatprep.subr.bf16.mxu0 %v296_v26  ;;  %361 = vmatprep.subr.bf16.mxu1 %v296_v26  ;;  %v91_v10 = vld [vmem:[#allocation5 + $0x198] sm:$0xff]  ;;  %v326_v11 = vpack.c.bf16 %v86_v8, %v84_v7  ;;  %v88_v13 = vld [vmem:[#allocation5 + $0x180] sm:$0xff]  ;;  %v90_v14 = vld [vmem:[#allocation5 + $0x190] sm:$0xff] }
  0x38   :  { %v328_v12 = vpack.c.bf16 %v91_v10, %v89_v9  ;;  %v93_v15 = vld [vmem:[#allocation5 + $0x1a8] sm:$0xff]  ;;  %v95_v16 = vld [vmem:[#allocation5 + $0x1b8] sm:$0xff]  ;;  %v330_v17 = vpack.c.bf16 %v90_v14, %v88_v13  ;;  %v92_v19 = vld [vmem:[#allocation5 + $0x1a0] sm:$0xff] }
  0x39   :  { %v332_v18 = vpack.c.bf16 %v95_v16, %v93_v15  ;;  %v94_v20 = vld [vmem:[#allocation5 + $0x1b0] sm:$0xff]  ;;  %v97_v21 = vld [vmem:[#allocation5 + $0x1c8] sm:$0xff]  ;;  %v99_v22 = vld [vmem:[#allocation5 + $0x1d8] sm:$0xff] }
  0x3a   :  { %299 = vmatpush1.bf16.msra.mxu0 %v298_v31  ;;  %363 = vmatpush1.bf16.msra.mxu1 %v298_v31  ;;  %v334_v23 = vpack.c.bf16 %v94_v20, %v92_v19  ;;  %v336_v24 = vpack.c.bf16 %v99_v22, %v97_v21  ;;  %v96_v25 = vld [vmem:[#allocation5 + $0x1c0] sm:$0xff]  ;;  %v98_v26 = vld [vmem:[#allocation5 + $0x1d0] sm:$0xff]  ;;  %v101_v27 = vld [vmem:[#allocation5 + $0x1e8] sm:$0xff] }
  0x3b   :  { %301 = vmatprep.subr.bf16.mxu0 %v300_v32  ;;  %365 = vmatprep.subr.bf16.mxu1 %v300_v32  ;;  %v103_v28 = vld [vmem:[#allocation5 + $0x1f8] sm:$0xff]  ;;  %v338_v29 = vpack.c.bf16 %v98_v26, %v96_v25  ;;  %v100_v31 = vld [vmem:[#allocation5 + $0x1e0] sm:$0xff]  ;;  %v102_v32 = vld [vmem:[#allocation5 + $0x1f0] sm:$0xff] }
  0x3c   :  { %v340_v30 = vpack.c.bf16 %v103_v28, %v101_v27  ;;  %v342_v33 = vpack.c.bf16 %v102_v32, %v100_v31  ;;  %v38_v34 = vld [vmem:[#allocation2] sm:$0xff] }
  0x3d   :  { %v175_v35 = vmul.f32 %v38_v34, %v38_v34 }
  0x3e   :  { %303 = vmatpush1.bf16.msra.mxu0 %v302_v37  ;;  %367 = vmatpush1.bf16.msra.mxu1 %v302_v37 }
  0x3f   :  { %305 = vmatprep.subr.bf16.mxu0 %v304_v38  ;;  %369 = vmatprep.subr.bf16.mxu1 %v304_v38 }
  0x42   :  { %307 = vmatpush1.bf16.msra.mxu0 %v306_v45  ;;  %371 = vmatpush1.bf16.msra.mxu1 %v306_v45 }
  0x43   :  { %309 = vmatprep.subr.bf16.mxu0 %v308_v46  ;;  %373 = vmatprep.subr.bf16.mxu1 %v308_v46 }
  0x46   :  { %311 = vmatpush1.bf16.msra.mxu0 %v310_v51  ;;  %375 = vmatpush1.bf16.msra.mxu1 %v310_v51 }
  0x47   :  { %313 = vmatprep.subr.bf16.mxu0 %v312_v52  ;;  %377 = vmatprep.subr.bf16.mxu1 %v312_v52 }
  0x4a   :  { %315 = vmatpush1.bf16.msra.mxu0 %v314_v57  ;;  %379 = vmatpush1.bf16.msra.mxu1 %v314_v57 }
  0x4b   :  { %317 = vmatprep.subr.bf16.mxu0 %v316_v58  ;;  %381 = vmatprep.subr.bf16.mxu1 %v316_v58 }
  0x4e   :  { %319 = vmatpush1.bf16.msra.mxu0 %v318_v63  ;;  %383 = vmatpush1.bf16.msra.mxu1 %v318_v63 }
  0x4f   :  { %321 = vmatprep.subr.bf16.mxu0 %v320_v0  ;;  %385 = vmatprep.subr.bf16.mxu1 %v320_v0 }
  0x52   :  { %323 = vmatpush1.bf16.msra.mxu0 %v322_v5  ;;  %387 = vmatpush1.bf16.msra.mxu1 %v322_v5 }
  0x53   :  { %325 = vmatprep.subr.bf16.mxu0 %v324_v6  ;;  %389 = vmatprep.subr.bf16.mxu1 %v324_v6 }
  0x56   :  { %327 = vmatpush1.bf16.msra.mxu0 %v326_v11  ;;  %391 = vmatpush1.bf16.msra.mxu1 %v326_v11 }
  0x57   :  { %329 = vmatprep.subr.bf16.mxu0 %v328_v12  ;;  %393 = vmatprep.subr.bf16.mxu1 %v328_v12 }
  0x5a   :  { %331 = vmatpush1.bf16.msra.mxu0 %v330_v17  ;;  %395 = vmatpush1.bf16.msra.mxu1 %v330_v17 }
  0x5b   :  { %333 = vmatprep.subr.bf16.mxu0 %v332_v18  ;;  %397 = vmatprep.subr.bf16.mxu1 %v332_v18 }
  0x5e   :  { %335 = vmatpush1.bf16.msra.mxu0 %v334_v23  ;;  %399 = vmatpush1.bf16.msra.mxu1 %v334_v23 }
  0x5f   :  { %337 = vmatprep.subr.bf16.mxu0 %v336_v24  ;;  %401 = vmatprep.subr.bf16.mxu1 %v336_v24 }
  0x62   :  { %339 = vmatpush1.bf16.msra.mxu0 %v338_v29  ;;  %403 = vmatpush1.bf16.msra.mxu1 %v338_v29 }
  0x63   :  { %341 = vmatprep.subr.bf16.mxu0 %v340_v30  ;;  %405 = vmatprep.subr.bf16.mxu1 %v340_v30 }
  0x66   :  { %343 = vmatpush1.bf16.msra.mxu0 %v342_v33  ;;  %407 = vmatpush1.bf16.msra.mxu1 %v342_v33 }
  0x69   :  { %169 = vmatmul.mubr.f32.vlgmr.msra.gmra.mrb[0].mxu0 %v38_v34  ;;  %242 = vmatmul.mubr.f32.vlgmr.msra.gmra.mrb[0].mxu1 %v175_v35 }
 0x13c   :  { %v170_v36 = vpop.f32.mrb[0].mxu0  ;;  %v243_v37 = vpop.f32.mrb[0].mxu1 }
 0x13d   :  { %v248_v38 = vmul.f32 %v170_v36, %v170_v36  ;;  %v172_v39 = vpop.f32.mrb[1].mxu0  ;;  %v245_v40 = vpop.f32.mrb[1].mxu1  ;;  %v254_v49 = vsub.f32 %v38_v34, %v170_v36 }
 0x13e   :  { %v249_v42 = vmul.f32 %v172_v39, %v172_v39  ;;  %v255_v51 = vsub.f32 %v540_v41, %v172_v39 }
 0x13f   :  { %v250_v43 = vsub.f32 %v243_v37, %v248_v38 }
 0x140   :  { %v251_v44 = vsub.f32 %v245_v40, %v249_v42 }
 0x141   :  { %v252_v45 = vmax.f32 %v250_v43, 0.0 }
 0x142   :  { %v253_v46 = vmax.f32 %v251_v44, 0.0 }
 0x143   :  { %v256_v47 = vadd.f32 1e-05, %v252_v45 }
 0x144   :  { %v257_v48 = vadd.f32 1e-05, %v253_v46 }
 0x145   :  { %413 = vrsqrt.f32 %v256_v47 }
 0x146   :  { %415 = vrsqrt.f32 %v257_v48 }
 0x14f   :  { %v414_v50 = vpop.eup %413 }
 0x150   :  { %v416_v52 = vpop.eup %415  ;;  %v260_v53 = vmul.f32 %v414_v50, %v254_v49 }
 0x151   :  { %v261_v54 = vmul.f32 %v416_v52, %v255_v51 }
 0x152   :  { %262 = vst [vmem:[#allocation7] sm:$0xff] %v260_v53 }
 0x153   :  { %263 = vst [vmem:[#allocation7 + $0x8] sm:$0xff] %v261_v54 }
 0x154   :  { %472 = shalt.err (!%p469_p6)
}
 0x155   :  { %s473_s10 = scalar_lea.hbm %s560_s2, 256 }
 0x156   :  { %p474_p7 = scmp.ne.s32.totalorder %s560_s2, %s473_s10  ;;  %p477_p8 = scmp.lt.u32.totalorder %s473_s10, %s560_s2 }
 0x158   :  { %p479_p9 = pnand %p477_p8, %p474_p7 }
 0x15a   :  { %482 = shalt.err (!%p479_p9)
}
 0x15b   :  { %273 = dma.vmem_to_hbm [thread:$0]  %s271_s6, 256, %s560_s2, [#allocation4]  }
 0x15c   :  { %487 = dma.done.wait [#allocation4], 256  }
 0x15d   :  { %488 = vsyncadd [#allocation4], 4294967040 }
 0x15e   :  { %277 = vsyncpa [#allocation3], 1 }
 0x15f   :  { %278 = vsyncpa [#allocation6], 1 }
 0x160   :  { %279 = vsyncpa [#allocation4], 1 }

</bundles_post_ra>
